<compile_context>
chip_gen: v7x
topology: tpu7x:2x2x1
jax: 0.10.0
libtpu: 0.0.40
codegen_flags: <defaults>
</compile_context>

<pallas_src>
import math

import jax
import jax.numpy as jnp
from jax.experimental import pallas as pl
from jax.experimental.pallas import tpu as pltpu


def _round_up(x, m):
    return ((x + m - 1) // m) * m


def _vmem_capacity_bytes():
    try:
        return int(pltpu.get_tpu_info().vmem_capacity_bytes)
    except Exception:
        return 64 << 20  # conservative fallback (v7x per-core VMEM)


def _pick_vmem_limit(needed_bytes):
    cap = _vmem_capacity_bytes()
    limit = max(needed_bytes + (4 << 20), 32 << 20)
    return int(min(limit, int(cap * 0.9)))


def _onehot_gather(idx_col, table, out_dtype):
    """Gather `table` rows for a (tb, 1) int32 index column via a one-hot MXU matmul.

    Exact row selection (one-hot entries are 0/1; HIGHEST precision f32 acc),
    lands the whole (tb, emb_dim) tile as dense unmasked stores.
    """
    tb = idx_col.shape[0]
    n = table.shape[0]
    iota = jax.lax.broadcasted_iota(jnp.int32, (tb, n), 1)
    onehot = (iota == idx_col).astype(table.dtype)
    out = jnp.dot(onehot, table,
                  preferred_element_type=jnp.float32,
                  precision=jax.lax.Precision.HIGHEST)
    return out.astype(out_dtype)


def _resident_kernel(h_idx_ref, r_idx_ref, t_idx_ref, ent_ref, rel_ref,
                     h_out_ref, r_out_ref, t_out_ref):
    ent = ent_ref[...]
    h_out_ref[...] = _onehot_gather(h_idx_ref[...], ent, h_out_ref.dtype)
    t_out_ref[...] = _onehot_gather(t_idx_ref[...], ent, t_out_ref.dtype)
    r_out_ref[...] = _onehot_gather(r_idx_ref[...], rel_ref[...], r_out_ref.dtype)


def transe_forward(entity_emb, relation_emb, head, rel, tail, *,
                   block_rows=None, force_hbm_gather=False):
    """Pallas TransE forward: returns (head_emb, rel_emb, tail_emb)."""
    batch = int(head.shape[0])
    num_entities, emb_dim = entity_emb.shape
    num_relations = relation_emb.shape[0]
    dt = entity_emb.dtype
    itemsize = jnp.dtype(dt).itemsize

    # Lane-pad the embedding dim to a multiple of 128 so every output store is
    # a dense unmasked vst (sliced back off after the call only if padded).
    emb_dim_p = _round_up(emb_dim, 128)
    if emb_dim_p != emb_dim:
        pad = ((0, 0), (0, emb_dim_p - emb_dim))
        entity_emb = jnp.pad(entity_emb, pad)
        relation_emb = jnp.pad(relation_emb, pad)

    # Rows gathered per grid step (multiple of 8 -> sublane-dense tiles).
    if block_rows is None:
        tb = min(128, _round_up(batch, 8))
    else:
        tb = _round_up(int(block_rows), 8)
    tb = max(tb, 8)
    padded = _round_up(batch, tb)
    n_blocks = padded // tb

    head = head.astype(jnp.int32).reshape(batch)
    rel = rel.astype(jnp.int32).reshape(batch)
    tail = tail.astype(jnp.int32).reshape(batch)
    if padded != batch:
        # Padded index slots gather row 0; the corresponding output rows are
        # never written back (outputs are sized to the true batch).
        zpad = jnp.zeros((padded - batch,), jnp.int32)
        head = jnp.concatenate([head, zpad])
        rel = jnp.concatenate([rel, zpad])
        tail = jnp.concatenate([tail, zpad])
    rel_2d = rel.reshape(padded, 1)

    out_shape = tuple(jax.ShapeDtypeStruct((batch, emb_dim_p), dt) for _ in range(3))

    # ---------- Fast path: both tables VMEM-resident, pure MXU gathers. ----------
    tables_bytes = 2 * (num_entities + num_relations) * emb_dim_p * itemsize
    fast_needed = (tables_bytes
                   + 3 * 2 * tb * emb_dim_p * itemsize          # double-buffered outputs
                   + 3 * 2 * tb * 128 * 4                       # index blocks
                   + 2 * tb * _round_up(num_entities, 128) * 4)  # one-hot temporaries
    use_resident = ((not force_hbm_gather)
                    and num_entities <= 8192
                    and fast_needed <= _vmem_capacity_bytes() // 2)

    if use_resident:
        head_2d = head.reshape(padded, 1)
        tail_2d = tail.reshape(padded, 1)
        idx_spec = pl.BlockSpec((tb, 1), lambda i: (i, 0))
        out_spec = pl.BlockSpec((tb, emb_dim_p), lambda i: (i, 0))
        grid_spec = pltpu.PrefetchScalarGridSpec(
            num_scalar_prefetch=0,
            grid=(n_blocks,),
            in_specs=[
                idx_spec, idx_spec, idx_spec,
                pl.BlockSpec((num_entities, emb_dim_p), lambda i: (0, 0)),
                pl.BlockSpec((num_relations, emb_dim_p), lambda i: (0, 0)),
            ],
            out_specs=[out_spec, out_spec, out_spec],
        )
        h_emb, r_emb, t_emb = pl.pallas_call(
            _resident_kernel,
            grid_spec=grid_spec,
            out_shape=out_shape,
            compiler_params=pltpu.CompilerParams(
                dimension_semantics=("parallel",),
                vmem_limit_bytes=_pick_vmem_limit(fast_needed),
            ),
        )(head_2d, rel_2d, tail_2d, entity_emb, relation_emb)

    # ---------- Scalable path: HBM row gathers straight into output tiles. ----------
    else:
        def kernel(head_idx_ref, tail_idx_ref,        # SMEM scalar-prefetched indices
                   rel_idx_ref,                       # (tb, 1) int32 VMEM block
                   ent_hbm_ref, rel_vmem_ref,         # HBM entity table, VMEM relation table
                   h_out_ref, r_out_ref, t_out_ref,   # (tb, emb_dim_p) output tiles
                   sem):                              # shared DMA sems: [0]=head, [1]=tail
            base = pl.program_id(0) * tb

            # 1) Issue all 2*tb entity-row gathers directly into the output
            #    tiles before waiting on any (all SMEM index reads happen
            #    before the first .wait(); many row DMAs in flight).
            copies = []
            for j in range(tb):
                h_idx = head_idx_ref[base + j]
                t_idx = tail_idx_ref[base + j]
                hc = pltpu.make_async_copy(ent_hbm_ref.at[h_idx], h_out_ref.at[j], sem.at[0])
                tc = pltpu.make_async_copy(ent_hbm_ref.at[t_idx], t_out_ref.at[j], sem.at[1])
                hc.start()
                tc.start()
                copies.append((hc, tc))

            # 2) Relation gather: one dense one-hot MXU matmul (MXU is otherwise
            #    idle here), done while the entity DMAs are in flight.
            r_out_ref[...] = _onehot_gather(rel_idx_ref[...], rel_vmem_ref[...],
                                            r_out_ref.dtype)

            # 3) Drain the gathers; Pallas's output writeback then overlaps the
            #    HBM store with the next grid step.
            for hc, tc in copies:
                hc.wait()
                tc.wait()

        hbm_needed = (2 * num_relations * emb_dim_p * itemsize   # resident relation table
                      + 3 * 2 * tb * emb_dim_p * itemsize        # double-buffered outputs
                      + 2 * tb * 128 * 4)                        # rel index blocks
        out_spec = pl.BlockSpec((tb, emb_dim_p), lambda i, *_: (i, 0))
        grid_spec = pltpu.PrefetchScalarGridSpec(
            num_scalar_prefetch=2,
            grid=(n_blocks,),
            in_specs=[
                pl.BlockSpec((tb, 1), lambda i, *_: (i, 0)),                     # rel indices
                pl.BlockSpec(memory_space=pl.ANY),                               # entity table (HBM)
                pl.BlockSpec((num_relations, emb_dim_p), lambda i, *_: (0, 0)),  # relation table
            ],
            out_specs=[out_spec, out_spec, out_spec],
            scratch_shapes=[pltpu.SemaphoreType.DMA((2,))],
        )
        h_emb, r_emb, t_emb = pl.pallas_call(
            kernel,
            grid_spec=grid_spec,
            out_shape=out_shape,
            compiler_params=pltpu.CompilerParams(
                dimension_semantics=("parallel",),
                vmem_limit_bytes=_pick_vmem_limit(hbm_needed),
            ),
        )(head, tail, rel_2d, entity_emb, relation_emb)

    if emb_dim_p != emb_dim:
        h_emb = h_emb[:, :emb_dim]
        r_emb = r_emb[:, :emb_dim]
        t_emb = t_emb[:, :emb_dim]
    return h_emb, r_emb, t_emb


def init_transe_params(key, num_entities, num_relations, emb_dim):
    """Deterministic re-implementation of TransE.__init__ parameter init."""
    bound = 6.0 / math.sqrt(emb_dim)
    k1, k2 = jax.random.split(key)
    entity_emb = jax.random.uniform(
        k1, (num_entities, emb_dim), jnp.float32, -bound, bound)
    relation_emb = jax.random.uniform(
        k2, (num_relations, emb_dim), jnp.float32, -bound, bound)
    # torch.nn.functional.normalize(w, p=1, dim=1): x / max(||x||_1, eps)
    l1 = jnp.maximum(jnp.sum(jnp.abs(relation_emb), axis=1, keepdims=True), 1e-12)
    relation_emb = relation_emb / l1
    return entity_emb, relation_emb


if __name__ == "__main__":
    num_entities, num_relations, emb_dim = 64, 16, 128
    batch = 24

    key = jax.random.PRNGKey(0)
    kp, kh, kr, kt = jax.random.split(key, 4)

    entity_emb, relation_emb = init_transe_params(
        kp, num_entities, num_relations, emb_dim)

    head = jax.random.randint(kh, (batch,), 0, num_entities, dtype=jnp.int32)
    rel  = jax.random.randint(kr, (batch,), 0, num_relations, dtype=jnp.int32)
    tail = jax.random.randint(kt, (batch,), 0, num_entities, dtype=jnp.int32)

    # Plain-JAX reference (same semantics as nn.Embedding lookups).
    ref = (jnp.take(entity_emb, head, axis=0),
           jnp.take(relation_emb, rel, axis=0),
           jnp.take(entity_emb, tail, axis=0))

    # Path 1: VMEM-resident tables, one-hot MXU gathers (taken automatically
    # because the tables are tiny).
    fast = transe_forward(entity_emb, relation_emb, head, rel, tail)
    jax.block_until_ready(fast)

    # Path 2: scalable HBM row-gather path, forced; uses 2 grid steps and a
    # partial last output block (batch=24, block_rows=16).
    slow = transe_forward(entity_emb, relation_emb, head, rel, tail,
                          block_rows=16, force_hbm_gather=True)
    jax.block_until_ready(slow)

    for got in (fast, slow):
        for g, r in zip(got, ref):
            assert g.shape == r.shape and g.dtype == r.dtype
            assert jnp.allclose(g, r, rtol=1e-6, atol=1e-6)

    print("KERNEL_OK")
</pallas_src>

<mosaic_0001>
module attributes {stable_mosaic.version = 11 : i64} {
  func.func @_resident_kernel(%arg0: i32, %arg1: memref<24x1xi32, #tpu.memory_space<vmem>>, %arg2: memref<24x1xi32, #tpu.memory_space<vmem>>, %arg3: memref<24x1xi32, #tpu.memory_space<vmem>>, %arg4: memref<64x128xf32, #tpu.memory_space<vmem>>, %arg5: memref<16x128xf32, #tpu.memory_space<vmem>>, %arg6: memref<24x128xf32, #tpu.memory_space<vmem>>, %arg7: memref<24x128xf32, #tpu.memory_space<vmem>>, %arg8: memref<24x128xf32, #tpu.memory_space<vmem>>) attributes {dimension_semantics = [#tpu.dimension_semantics<parallel>], iteration_bounds = array<i64: 1>, scalar_prefetch = 0 : i64, scratch_operands = 0 : i64, tpu.core_type = #tpu.core_type<tc>, window_params = [{transform_indices = @transform_0, window_bounds = array<i64: 24, 1>}, {transform_indices = @transform_1, window_bounds = array<i64: 24, 1>}, {transform_indices = @transform_2, window_bounds = array<i64: 24, 1>}, {pipeline_mode = #tpu.pipeline_mode<synchronous>, transform_indices = @transform_3, window_bounds = array<i64: 64, 128>}, {pipeline_mode = #tpu.pipeline_mode<synchronous>, transform_indices = @transform_4, window_bounds = array<i64: 16, 128>}, {transform_indices = @transform_5, window_bounds = array<i64: 24, 128>}, {transform_indices = @transform_6, window_bounds = array<i64: 24, 128>}, {transform_indices = @transform_7, window_bounds = array<i64: 24, 128>}]} {
    %c0 = arith.constant 0 : index
    %c0_0 = arith.constant 0 : index
    %0 = vector.load %arg4[%c0, %c0_0] : memref<64x128xf32, #tpu.memory_space<vmem>>, vector<64x128xf32>
    %c0_1 = arith.constant 0 : index
    %c0_2 = arith.constant 0 : index
    %1 = vector.load %arg1[%c0_1, %c0_2] : memref<24x1xi32, #tpu.memory_space<vmem>>, vector<24x1xi32>
    %2 = tpu.iota {dimensions = array<i32: 1>} : vector<24x64xi32>
    %3 = vector.broadcast %1 : vector<24x1xi32> to vector<24x64xi32>
    %4 = arith.cmpi eq, %2, %3 : vector<24x64xi32>
    %5 = arith.extui %4 : vector<24x64xi1> to vector<24x64xi32>
    %6 = arith.sitofp %5 : vector<24x64xi32> to vector<24x64xf32>
    %cst = arith.constant dense<0.000000e+00> : vector<24x128xf32>
    %7 = tpu.matmul %6, %0, %cst {dimension_numbers = #tpu.dot_dimension_numbers<[1], [0], [0], [1], [0, 0, 1, 1], [], []>, precision = #tpu.contract_precision<fp32>} : vector<24x64xf32>, vector<64x128xf32>, vector<24x128xf32> -> vector<24x128xf32>
    %c0_3 = arith.constant 0 : index
    %c0_4 = arith.constant 0 : index
    %8 = vector.load %arg6[%c0_3, %c0_4] : memref<24x128xf32, #tpu.memory_space<vmem>>, vector<24x128xf32>
    tpu.vector_store %arg6[%c0_3, %c0_4], %7 {strides = array<i32>} : memref<24x128xf32, #tpu.memory_space<vmem>>, vector<24x128xf32>,
    %c0_5 = arith.constant 0 : index
    %c0_6 = arith.constant 0 : index
    %9 = vector.load %arg3[%c0_5, %c0_6] : memref<24x1xi32, #tpu.memory_space<vmem>>, vector<24x1xi32>
    %10 = tpu.iota {dimensions = array<i32: 1>} : vector<24x64xi32>
    %11 = vector.broadcast %9 : vector<24x1xi32> to vector<24x64xi32>
    %12 = arith.cmpi eq, %10, %11 : vector<24x64xi32>
    %13 = arith.extui %12 : vector<24x64xi1> to vector<24x64xi32>
    %14 = arith.sitofp %13 : vector<24x64xi32> to vector<24x64xf32>
    %cst_7 = arith.constant dense<0.000000e+00> : vector<24x128xf32>
    %15 = tpu.matmul %14, %0, %cst_7 {dimension_numbers = #tpu.dot_dimension_numbers<[1], [0], [0], [1], [0, 0, 1, 1], [], []>, precision = #tpu.contract_precision<fp32>} : vector<24x64xf32>, vector<64x128xf32>, vector<24x128xf32> -> vector<24x128xf32>
    %c0_8 = arith.constant 0 : index
    %c0_9 = arith.constant 0 : index
    %16 = vector.load %arg8[%c0_8, %c0_9] : memref<24x128xf32, #tpu.memory_space<vmem>>, vector<24x128xf32>
    tpu.vector_store %arg8[%c0_8, %c0_9], %15 {strides = array<i32>} : memref<24x128xf32, #tpu.memory_space<vmem>>, vector<24x128xf32>,
    %c0_10 = arith.constant 0 : index
    %c0_11 = arith.constant 0 : index
    %17 = vector.load %arg2[%c0_10, %c0_11] : memref<24x1xi32, #tpu.memory_space<vmem>>, vector<24x1xi32>
    %c0_12 = arith.constant 0 : index
    %c0_13 = arith.constant 0 : index
    %18 = vector.load %arg5[%c0_12, %c0_13] : memref<16x128xf32, #tpu.memory_space<vmem>>, vector<16x128xf32>
    %19 = tpu.iota {dimensions = array<i32: 1>} : vector<24x16xi32>
    %20 = vector.broadcast %17 : vector<24x1xi32> to vector<24x16xi32>
    %21 = arith.cmpi eq, %19, %20 : vector<24x16xi32>
    %22 = arith.extui %21 : vector<24x16xi1> to vector<24x16xi32>
    %23 = arith.sitofp %22 : vector<24x16xi32> to vector<24x16xf32>
    %cst_14 = arith.constant dense<0.000000e+00> : vector<24x128xf32>
    %24 = tpu.matmul %23, %18, %cst_14 {dimension_numbers = #tpu.dot_dimension_numbers<[1], [0], [0], [1], [0, 0, 1, 1], [], []>, precision = #tpu.contract_precision<fp32>} : vector<24x16xf32>, vector<16x128xf32>, vector<24x128xf32> -> vector<24x128xf32>
    %c0_15 = arith.constant 0 : index
    %c0_16 = arith.constant 0 : index
    %25 = vector.load %arg7[%c0_15, %c0_16] : memref<24x128xf32, #tpu.memory_space<vmem>>, vector<24x128xf32>
    tpu.vector_store %arg7[%c0_15, %c0_16], %24 {strides = array<i32>} : memref<24x128xf32, #tpu.memory_space<vmem>>, vector<24x128xf32>,
    return
  }
  func.func @transform_0(%arg0: i32) -> (i32, i32) {
    %c0_i32 = arith.constant 0 : i32
    %c0_i32_0 = arith.constant 0 : i32
    return %arg0, %c0_i32 : i32, i32
  }
  func.func @transform_1(%arg0: i32) -> (i32, i32) {
    %c0_i32 = arith.constant 0 : i32
    %c0_i32_0 = arith.constant 0 : i32
    return %arg0, %c0_i32 : i32, i32
  }
  func.func @transform_2(%arg0: i32) -> (i32, i32) {
    %c0_i32 = arith.constant 0 : i32
    %c0_i32_0 = arith.constant 0 : i32
    return %arg0, %c0_i32 : i32, i32
  }
  func.func @transform_3(%arg0: i32) -> (i32, i32) {
    %c0_i32 = arith.constant 0 : i32
    %c0_i32_0 = arith.constant 0 : i32
    %c0_i32_1 = arith.constant 0 : i32
    return %c0_i32, %c0_i32_0 : i32, i32
  }
  func.func @transform_4(%arg0: i32) -> (i32, i32) {
    %c0_i32 = arith.constant 0 : i32
    %c0_i32_0 = arith.constant 0 : i32
    %c0_i32_1 = arith.constant 0 : i32
    return %c0_i32, %c0_i32_0 : i32, i32
  }
  func.func @transform_5(%arg0: i32) -> (i32, i32) {
    %c0_i32 = arith.constant 0 : i32
    %c0_i32_0 = arith.constant 0 : i32
    return %arg0, %c0_i32 : i32, i32
  }
  func.func @transform_6(%arg0: i32) -> (i32, i32) {
    %c0_i32 = arith.constant 0 : i32
    %c0_i32_0 = arith.constant 0 : i32
    return %arg0, %c0_i32 : i32, i32
  }
  func.func @transform_7(%arg0: i32) -> (i32, i32) {
    %c0_i32 = arith.constant 0 : i32
    %c0_i32_0 = arith.constant 0 : i32
    return %arg0, %c0_i32 : i32, i32
  }
}

</mosaic_0001>

<bundles_post_ra>
// kernel: tpu_custom_call.1
= control target key start
LH: loop header
LB: loop body
LE: loop exit
PB: predicated region body
PF: predicated region fallthrough
CT: control target
= control target key end

     0   :  { %13 = vsyncpa [#allocation3], 0  ;;  %v2883_v2 = vmov 0   ;;  %v2884_v5 = vmov 0.0|0.0   ;;  %s3483_s0 = inlined_call_operand.vmem [shape: s32[24,1], index: 0, kind: input, shape index: {}]   ;;  %s3484_s1 = inlined_call_operand.vmem [shape: s32[24,1], index: 1, kind: input, shape index: {}]   ;;  %s3485_s2 = inlined_call_operand.vmem [shape: s32[24,1], index: 2, kind: input, shape index: {}]   ;;  %s3486_s3 = inlined_call_operand.vmem [shape: f32[64,128], index: 3, kind: input, shape index: {}]   ;;  %s3487_s4 = inlined_call_operand.vmem [shape: f32[16,128], index: 4, kind: input, shape index: {}]   ;;  %s3488_s5 = inlined_call_operand.hbm [shape: f32[24,128], index: 5, kind: output, shape index: {0}]   ;;  %s3489_s6 = inlined_call_operand.hbm [shape: f32[24,128], index: 6, kind: output, shape index: {1}]   ;;  %s3490_s7 = inlined_call_operand.hbm [shape: f32[24,128], index: 7, kind: output, shape index: {2}]  }
   0x1   :  { %v35_v0 = vld [vmem:[%s3483_s0 + $0x10] sm:$0xff]  ;;  %v33_v1 = vld [vmem:[%s3483_s0] sm:$0xff]  ;;  %2812 = vset.pattern.permute.xlu1 %v2883_v2  ;;  %2811 = vset.pattern.permute.xlu0 %v2883_v2  ;;  %v34_v4 = vld [vmem:[%s3483_s0 + $0x8] sm:$0xff] }
   0x2   :  { %45 = vperm.xlu1 %2812, %v35_v0   ;;  %39 = vperm.xlu0 %2811, %v33_v1   ;;  %v692_v3 = vld [vmem:[%s3485_s2] sm:$0xff]  ;;  %v26_v7 = vld [vmem:[%s3486_s3 + $0x8] sm:$0xff]  ;;  %v27_v8 = vld [vmem:[%s3486_s3 + $0x10] sm:$0xff] }
   0x3   :  { %2576 = vmatprep.subr.bf16.mxu0 %v2884_v5  ;;  %v25_v6 = vld [vmem:[%s3486_s3] sm:$0xff]  ;;  %2552 = vmatprep.subr.bf16.mxu1 %v2884_v5  ;;  %v70_v10 = vand.u32 4294901760, %v26_v7  ;;  %v28_v11 = vld [vmem:[%s3486_s3 + $0x18] sm:$0xff]  ;;  %v73_v12 = vand.u32 4294901760, %v27_v8  ;;  %v30_v14 = vld [vmem:[%s3486_s3 + $0x28] sm:$0xff] }
   0x4   :  { %v67_v9 = vand.u32 4294901760, %v25_v6  ;;  %v29_v13 = vld [vmem:[%s3486_s3 + $0x20] sm:$0xff]  ;;  %v76_v15 = vand.u32 4294901760, %v28_v11  ;;  %v31_v19 = vld [vmem:[%s3486_s3 + $0x30] sm:$0xff]  ;;  %v32_v20 = vld [vmem:[%s3486_s3 + $0x38] sm:$0xff] }
   0x5   :  { %v2968_v18 = vsub.f32 %v26_v7, %v70_v10 }
   0x6   :  { %696 = vperm.xlu1 %2812, %v692_v3   ;;  %42 = vperm.xlu0 %2811, %v34_v4   ;;  %v2964_v16 = vpack.c.bf16 %v70_v10, %v67_v9  ;;  %v2966_v17 = vsub.f32 %v25_v6, %v67_v9 }
   0x7   :  { %14 = vsyncpa [#allocation5], 0  ;;  %v694_v21 = vld [vmem:[%s3485_s2 + $0x10] sm:$0xff]  ;;  %v693_v22 = vld [vmem:[%s3485_s2 + $0x8] sm:$0xff]  ;;  %v2982_v23 = vsub.f32 %v27_v8, %v73_v12  ;;  %v2984_v24 = vsub.f32 %v28_v11, %v76_v15  ;;  %v79_v25 = vand.u32 4294901760, %v29_v13  ;;  %v82_v26 = vand.u32 4294901760, %v30_v14 }
   0x8   :  { %vm2885_vm0 = vmmov 0   ;;  %v2886_v27 = vmov 0.0   ;;  %v172_v28 = vand.u32 4294901760, %v2966_v17  ;;  %v179_v29 = vand.u32 4294901760, %v2968_v18  ;;  %2554 = vmatpush3.bf16.msra.mxu1 %v2964_v16  ;;  %v1349_v38 = vld [vmem:[%s3484_s1 + $0x8] sm:$0xff]  ;;  %v1348_v39 = vld [vmem:[%s3484_s1] sm:$0xff] }
   0x9   :  { %2240 = vmatprep.mubr.msk.f32.mxu0 %vm2885_vm0, %v2886_v27  ;;  %v2992_v30 = vpack.c.bf16 %v2968_v18, %v2966_v17  ;;  %v2994_v31 = vpack.c.bf16 %v76_v15, %v73_v12  ;;  %2190 = vmatprep.mubr.msk.f32.mxu1 %vm2885_vm0, %v2886_v27  ;;  %v85_v32 = vand.u32 4294901760, %v31_v19  ;;  %v88_v33 = vand.u32 4294901760, %v32_v20  ;;  %v1350_v53 = vld [vmem:[%s3484_s1 + $0x10] sm:$0xff] }
   0xa   :  { %2555 = vmatprep.subr.bf16.mxu1 %v2884_v5  ;;  %702 = vperm.xlu1 %2812, %v694_v21   ;;  %v173_v34 = vsub.f32 %v2966_v17, %v172_v28  ;;  %v180_v35 = vsub.f32 %v2968_v18, %v179_v29  ;;  %v186_v36 = vand.u32 4294901760, %v2982_v23  ;;  %v193_v37 = vand.u32 4294901760, %v2984_v24 }
   0xb   :  { %699 = vperm.xlu0 %2811, %v693_v22   ;;  %2578 = vmatpush3.bf16.msra.mxu0 %v2992_v30  ;;  %v3013_v40 = vpack.c.bf16 %v2984_v24, %v2982_v23  ;;  %v3015_v41 = vpack.c.bf16 %v82_v26, %v79_v25  ;;  %v199_v42 = vsub.f32 %v29_v13, %v79_v25  ;;  %v36_v13 = vlaneseq }
   0xc   :  { %v206_v43 = vsub.f32 %v30_v14, %v82_v26  ;;  %2579 = vmatprep.subr.bf16.mxu0 %v2884_v5  ;;  %2557 = vmatpush3.bf16.msra.mxu1 %v2994_v31  ;;  %v174_v44 = vand.u32 4294901760, %v173_v34  ;;  %v181_v45 = vand.u32 4294901760, %v180_v35  ;;  %v187_v46 = vsub.f32 %v2982_v23, %v186_v36 }
   0xd   :  { %v194_v47 = vsub.f32 %v2984_v24, %v193_v37  ;;  %v213_v48 = vsub.f32 %v31_v19, %v85_v32  ;;  %2558 = vmatprep.subr.bf16.mxu1 %v2884_v5  ;;  %v220_v49 = vsub.f32 %v32_v20, %v88_v33  ;;  %v200_v55 = vand.u32 4294901760, %v199_v42 }
   0xe   :  { %1357 = vperm.xlu1 %2812, %v1349_v38   ;;  %v3022_v50 = vpack.c.bf16 %v181_v45, %v174_v44  ;;  %v188_v51 = vand.u32 4294901760, %v187_v46  ;;  %v3028_v54 = vpack.c.bf16 %v206_v43, %v199_v42  ;;  %v207_v56 = vand.u32 4294901760, %v206_v43 }
   0xf   :  { %1354 = vperm.xlu0 %2811, %v1348_v39   ;;  %v195_v52 = vand.u32 4294901760, %v194_v47  ;;  %2581 = vmatpush3.bf16.msra.mxu0 %v3013_v40  ;;  %v3031_v57 = vpack.c.bf16 %v88_v33, %v85_v32  ;;  %v201_v59 = vsub.f32 %v199_v42, %v200_v55  ;;  %v3037_v61 = vpack.c.bf16 %v220_v49, %v213_v48 }
  0x10   :  { %2582 = vmatprep.subr.bf16.mxu0 %v2884_v5  ;;  %2560 = vmatpush3.bf16.msra.mxu1 %v3015_v41  ;;  %v208_v60 = vsub.f32 %v206_v43, %v207_v56  ;;  %v214_v0 = vand.u32 4294901760, %v213_v48  ;;  %v221_v1 = vand.u32 4294901760, %v220_v49  ;;  %v3046_v6 = vpack.c.bf16 %v179_v29, %v172_v28 }
  0x11   :  { %v3034_v58 = vpack.c.bf16 %v195_v52, %v188_v51  ;;  %2561 = vmatprep.subr.bf16.mxu1 %v2884_v5  ;;  %v202_v62 = vand.u32 4294901760, %v201_v59  ;;  %v3051_v10 = vpack.c.bf16 %v193_v37, %v186_v36  ;;  %v3053_v11 = vpack.c.bf16 %v207_v56, %v200_v55 }
  0x12   :  { %v209_v63 = vand.u32 4294901760, %v208_v60  ;;  %v215_v3 = vsub.f32 %v213_v48, %v214_v0  ;;  %v222_v4 = vsub.f32 %v220_v49, %v221_v1  ;;  %v3055_v12 = vpack.c.bf16 %v221_v1, %v214_v0  ;;  %v1352_v0 = vld [vmem:[%s3487_s4 + $0x8] sm:$0xff] }
  0x13   :  { %1360 = vperm.xlu0 %2811, %v1350_v53   ;;  %2584 = vmatpush3.bf16.msra.mxu0 %v3028_v54  ;;  %v3057_v14 = vand.u32 127, %v36_v13  ;;  %vm56_vm1 = vcmask 523264   ;;  %v1385_v13 = vand.u32 4294901760, %v1352_v0  ;;  %vm1371_vm9 = vcmask 130048  }
  0x14   :  { %2585 = vmatprep.subr.bf16.mxu0 %v2884_v5  ;;  %2563 = vmatpush3.bf16.msra.mxu1 %v3031_v57  ;;  %v3043_v2 = vpack.c.bf16 %v209_v63, %v202_v62  ;;  %v216_v7 = vand.u32 4294901760, %v215_v3  ;;  %v223_v8 = vand.u32 4294901760, %v222_v4  ;;  %v1351_v63 = vld [vmem:[%s3487_s4] sm:$0xff]  ;;  %s2887_s4 = smov [#allocation2]  }
  0x15   :  { %2564 = vmatprep.subr.bf16.mxu1 %v2884_v5  ;;  %s1934_s12 = sshll.u32 %s2887_s4, 4  ;;  %s1935_s12 = int_to_ptr.vmem [resolvable:$true] %s1934_s12 }
  0x16   :  { %v3049_v9 = vpack.c.bf16 %v223_v8, %v216_v7  ;;  %v1382_v8 = vand.u32 4294901760, %v1351_v63  ;;  %s2813_s13 = scalar_lea.vmem %s1935_s12, 384  ;;  %p2818_p1 = scmp.lt.s32.totalorder %s1935_s12, %s1935_s12 }
  0x17   :  { %2587 = vmatpush3.bf16.msra.mxu0 %v3037_v61  ;;  %p2814_p0 = scmp.ne.s32.totalorder %s1935_s12, %s2813_s13  ;;  %p2819_p2 = scmp.lt.s32.totalorder %s2813_s13, %s2813_s13 }
  0x18   :  { %2588 = vmatprep.subr.bf16.mxu0 %v2884_v5 }
  0x19   :  { %p2820_p3 = por %p2819_p2, %p2818_p1 }
  0x1b   :  { %p2821_p4 = pnand %p2820_p3, %p2814_p0 }
  0x81   :  { %v46_v15 = vpop.permute.xlu1 %45  ;;  %v40_v17 = vpop.permute.xlu0 %39 }
  0x82   :  { %vm49_vm2 = vcmp.eq.s32.totalorder %v3057_v14, %v46_v15  ;;  %vm47_vm3 = vcmp.eq.s32.totalorder %v3057_v14, %v40_v17 }
  0x83   :  { %v3062_v18 = vsel %vm49_vm2, 1.0, %v2886_v27  ;;  %v3065_v19 = vsel %vm47_vm3, 1.0, %v2886_v27 }
  0x84   :  { %v58_v20 = vsel %vm56_vm1, %v3065_v19, 0  ;;  %v64_v21 = vsel %vm56_vm1, %v3062_v18, 0 }
  0x85   :  { %v43_v22 = vpop.permute.xlu0 %42  ;;  %v140_v23 = vsub.f32 %v58_v20, %v58_v20  ;;  %v160_v24 = vsub.f32 %v64_v21, %v64_v21  ;;  %v697_v42 = vpop.permute.xlu1 %696  ;;  %v3208_v21 = vsub.f32 %v1352_v0, %v1385_v13 }
  0x86   :  { %vm48_vm4 = vcmp.eq.s32.totalorder %v3057_v14, %v43_v22  ;;  %vm704_vm5 = vcmp.eq.s32.totalorder %v3057_v14, %v697_v42 }
  0x87   :  { %v3073_v25 = vsel %vm48_vm4, 1.0, %v2886_v27  ;;  %2241 = vmatmul.mubr.f32.vlgmr.msra.gmra.mrb[0].mxu0 %v140_v23  ;;  %v141_v26 = vand.u32 4294901760, %v140_v23  ;;  %v161_v33 = vand.u32 4294901760, %v160_v24  ;;  %v3107_v44 = vsel %vm704_vm5, 1.0, %v2886_v27 }
  0x88   :  { %2590 = vmatpush3.bf16.msra.mxu0 %v2964_v16  ;;  %2243 = vmatprep.mubr.msk.f32.mxu0 %vm2885_vm0, %v2886_v27  ;;  %v61_v28 = vsel %vm56_vm1, %v3073_v25, 0  ;;  %v714_v45 = vsel %vm56_vm1, %v3107_v44, 0 }
  0x89   :  { %2591 = vmatprep.subr.bf16.mxu0 %v2884_v5  ;;  %v150_v29 = vsub.f32 %v61_v28, %v61_v28  ;;  %v142_v32 = vsub.f32 %v140_v23, %v141_v26  ;;  %v162_v37 = vsub.f32 %v160_v24, %v161_v33  ;;  %v703_v46 = vpop.permute.xlu1 %702  ;;  %v3127_v48 = vsub.f32 %v714_v45, %v714_v45 }
  0x8a   :  { %v700_v43 = vpop.permute.xlu0 %699  ;;  %vm706_vm7 = vcmp.eq.s32.totalorder %v3057_v14, %v703_v46  ;;  %v3225_v28 = vpack.c.bf16 %v1385_v13, %v1382_v8 }
  0x8b   :  { %2244 = vmatmul.mubr.f32.gmra.mrb[2].mxu0 %v150_v29  ;;  %v143_v34 = vand.u32 4294901760, %v142_v32  ;;  %v151_v35 = vand.u32 4294901760, %v150_v29  ;;  %v163_v39 = vand.u32 4294901760, %v162_v37  ;;  %vm705_vm6 = vcmp.eq.s32.totalorder %v3057_v14, %v700_v43 }
  0x8c   :  { %2593 = vmatpush3.bf16.msra.mxu0 %v2994_v31  ;;  %2246 = vmatprep.mubr.msk.f32.mxu0 %vm2885_vm0, %v2886_v27  ;;  %v3121_v47 = vsel %vm705_vm6, 1.0, %v2886_v27  ;;  %v3137_v51 = vsel %vm706_vm7, 1.0, %v2886_v27  ;;  %v797_v52 = vand.u32 4294901760, %v3127_v48  ;;  %v1488_v32 = vand.u32 4294901760, %v3208_v21 }
  0x8d   :  { %2191 = vmatmul.mubr.f32.vlgmr.msra.gmra.mrb[0].mxu1 %v143_v34  ;;  %2594 = vmatprep.subr.bf16.mxu0 %v2884_v5  ;;  %v152_v36 = vsub.f32 %v150_v29, %v151_v35  ;;  %v717_v49 = vsel %vm56_vm1, %v3121_v47, 0  ;;  %v720_v55 = vsel %vm56_vm1, %v3137_v51, 0  ;;  %v1358_v7 = vpop.permute.xlu1 %1357 }
  0x8e   :  { %2566 = vmatpush3.bf16.msra.mxu1 %v3022_v50  ;;  %2193 = vmatprep.mubr.msk.f32.mxu1 %vm2885_vm0, %v2886_v27  ;;  %v3147_v53 = vsub.f32 %v717_v49, %v717_v49  ;;  %v798_v56 = vsub.f32 %v3127_v48, %v797_v52  ;;  %v3162_v59 = vsub.f32 %v720_v55, %v720_v55  ;;  %v1355_v62 = vpop.permute.xlu0 %1354 }
  0x8f   :  { %2567 = vmatprep.subr.bf16.mxu1 %v2884_v5  ;;  %2247 = vmatmul.mubr.f32.gmra.mrb[4].mxu0 %v160_v24  ;;  %v153_v38 = vand.u32 4294901760, %v152_v36  ;;  %vm1362_vm8 = vcmp.eq.s32.totalorder %v3057_v14, %v1355_v62  ;;  %vm1363_vm10 = vcmp.eq.s32.totalorder %v3057_v14, %v1358_v7 }
  0x90   :  { %2596 = vmatpush3.bf16.msra.mxu0 %v3015_v41  ;;  %2265 = vmatprep.mubr.msk.f32.mxu0 %vm2885_vm0, %v2886_v27  ;;  %v807_v60 = vand.u32 4294901760, %v3147_v53  ;;  %v799_v1 = vand.u32 4294901760, %v798_v56  ;;  %v817_v4 = vand.u32 4294901760, %v3162_v59  ;;  %v3192_v15 = vsel %vm1362_vm8, 1.0, %v2886_v27 }
  0x91   :  { %2597 = vmatprep.subr.bf16.mxu0 %v2884_v5  ;;  %2194 = vmatmul.mubr.f32.gmra.mrb[2].mxu1 %v153_v38  ;;  %v1373_v22 = vsel %vm1371_vm9, %v3192_v15, 0  ;;  %v3215_v23 = vsel %vm1363_vm10, 1.0, %v2886_v27 }
  0x92   :  { %2569 = vmatpush3.bf16.msra.mxu1 %v3034_v58  ;;  %2196 = vmatprep.mubr.msk.f32.mxu1 %vm2885_vm0, %v2886_v27  ;;  %v808_v3 = vsub.f32 %v3147_v53, %v807_v60  ;;  %v818_v20 = vsub.f32 %v3162_v59, %v817_v4 }
  0x93   :  { %2570 = vmatprep.subr.bf16.mxu1 %v2884_v5 }
  0x94   :  { %2599 = vmatpush3.bf16.msra.mxu0 %v3031_v57  ;;  %v809_v17 = vand.u32 4294901760, %v808_v3  ;;  %v819_v24 = vand.u32 4294901760, %v818_v20 }
  0x95   :  { %2600 = vmatprep.subr.bf16.mxu0 %v2884_v5  ;;  %2197 = vmatmul.mubr.f32.gmra.mrb[4].mxu1 %v163_v39 }
  0x96   :  { %2572 = vmatpush3.bf16.msra.mxu1 %v3043_v2  ;;  %2215 = vmatprep.mubr.msk.f32.mxu1 %vm2885_vm0, %v2886_v27 }
  0x97   :  { %2266 = vmatmul.mubr.f32.vlgmr.msra.gmra.mrb[0].mxu0 %v141_v26  ;;  %2573 = vmatprep.subr.bf16.mxu1 %v2884_v5  ;;  %v3222_v26 = vsub.f32 %v1373_v22, %v1373_v22 }
  0x98   :  { %2602 = vmatpush3.bf16.msra.mxu0 %v3046_v6  ;;  %2268 = vmatprep.mubr.msk.f32.mxu0 %vm2885_vm0, %v2886_v27 }
  0x99   :  { %2603 = vmatprep.subr.bf16.mxu0 %v2884_v5  ;;  %v1450_v34 = vand.u32 4294901760, %v3222_v26 }
  0x9a   :  { %2575 = vmatpush3.bf16.msra.mxu1 %v3049_v9 }
  0x9b   :  { %2269 = vmatmul.mubr.f32.gmra.mrb[2].mxu0 %v151_v35  ;;  %2624 = vmatprep.subr.bf16.mxu1 %v2884_v5  ;;  %v1451_v35 = vsub.f32 %v3222_v26, %v1450_v34 }
  0x9c   :  { %2605 = vmatpush3.bf16.msra.mxu0 %v3051_v10  ;;  %2271 = vmatprep.mubr.msk.f32.mxu0 %vm2885_vm0, %v2886_v27 }
  0x9d   :  { %2606 = vmatprep.subr.bf16.mxu0 %v2884_v5  ;;  %2216 = vmatmul.mubr.msk.f32.vlgmr.msra.gmra.mrb[0].mxu1 %vm56_vm1, %v3065_v19 }
  0x9e   :  { %2626 = vmatpush3.bf16.msra.mxu1 %v2964_v16  ;;  %2218 = vmatprep.mubr.msk.f32.mxu1 %vm2885_vm0, %v2886_v27 }
  0x9f   :  { %2272 = vmatmul.mubr.f32.gmra.mrb[4].mxu0 %v161_v33  ;;  %2627 = vmatprep.subr.bf16.mxu1 %v2884_v5 }
  0xa0   :  { %2608 = vmatpush3.bf16.msra.mxu0 %v3053_v11  ;;  %2290 = vmatprep.mubr.msk.f32.mxu0 %vm2885_vm0, %v2886_v27 }
  0xa1   :  { %2609 = vmatprep.subr.bf16.mxu0 %v2884_v5  ;;  %2219 = vmatmul.mubr.msk.f32.gmra.mrb[2].mxu1 %vm56_vm1, %v3073_v25 }
  0xa2   :  { %2629 = vmatpush3.bf16.msra.mxu1 %v2994_v31  ;;  %2221 = vmatprep.mubr.msk.f32.mxu1 %vm2885_vm0, %v2886_v27 }
  0xa3   :  { %2630 = vmatprep.subr.bf16.mxu1 %v2884_v5 }
  0xa4   :  { %2611 = vmatpush3.bf16.msra.mxu0 %v3055_v12 }
  0xa5   :  { %2612 = vmatprep.subr.bf16.mxu0 %v2884_v5  ;;  %2222 = vmatmul.mubr.msk.f32.gmra.mrb[4].mxu1 %vm56_vm1, %v3062_v18 }
  0xa6   :  { %2632 = vmatpush3.bf16.msra.mxu1 %v3015_v41  ;;  %2340 = vmatprep.mubr.msk.f32.mxu1 %vm2885_vm0, %v2886_v27 }
  0xa7   :  { %2291 = vmatmul.mubr.msk.f32.vlgmr.msra.gmra.mrb[0].mxu0 %vm56_vm1, %v3065_v19  ;;  %2633 = vmatprep.subr.bf16.mxu1 %v2884_v5 }
  0xa8   :  { %2614 = vmatpush3.bf16.msra.mxu0 %v2964_v16  ;;  %2293 = vmatprep.mubr.msk.f32.mxu0 %vm2885_vm0, %v2886_v27 }
  0xa9   :  { %2615 = vmatprep.subr.bf16.mxu0 %v2884_v5 }
  0xaa   :  { %2635 = vmatpush3.bf16.msra.mxu1 %v3031_v57 }
  0xab   :  { %2294 = vmatmul.mubr.msk.f32.gmra.mrb[2].mxu0 %vm56_vm1, %v3073_v25  ;;  %2636 = vmatprep.subr.bf16.mxu1 %v2884_v5 }
  0xac   :  { %2617 = vmatpush3.bf16.msra.mxu0 %v2994_v31  ;;  %2296 = vmatprep.mubr.msk.f32.mxu0 %vm2885_vm0, %v2886_v27 }
  0xad   :  { %2618 = vmatprep.subr.bf16.mxu0 %v2884_v5  ;;  %2341 = vmatmul.mubr.f32.vlgmr.msra.gmra.mrb[6].mxu1 %v799_v1 }
  0xae   :  { %2638 = vmatpush3.bf16.msra.mxu1 %v3022_v50  ;;  %2343 = vmatprep.mubr.msk.f32.mxu1 %vm2885_vm0, %v2886_v27  ;;  %v3206_v50 = vsub.f32 %v1351_v63, %v1382_v8 }
  0xaf   :  { %2297 = vmatmul.mubr.msk.f32.gmra.mrb[4].mxu0 %vm56_vm1, %v3062_v18  ;;  %2639 = vmatprep.subr.bf16.mxu1 %v2884_v5 }
  0xb0   :  { %2620 = vmatpush3.bf16.msra.mxu0 %v3015_v41  ;;  %2315 = vmatprep.mubr.msk.f32.mxu0 %vm2885_vm0, %v2886_v27  ;;  %v1481_v29 = vand.u32 4294901760, %v3206_v50 }
  0xb1   :  { %2621 = vmatprep.subr.bf16.mxu0 %v2884_v5  ;;  %2344 = vmatmul.mubr.f32.gmra.mrb[8].mxu1 %v809_v17 }
  0xb2   :  { %2641 = vmatpush3.bf16.msra.mxu1 %v3034_v58  ;;  %2346 = vmatprep.mubr.msk.f32.mxu1 %vm2885_vm0, %v2886_v27  ;;  %v1376_v58 = vsel %vm1371_vm9, %v3215_v23, 0  ;;  %v2709_v42 = vpack.c.bf16 %v1488_v32, %v1481_v29 }
  0xb3   :  { %2642 = vmatprep.subr.bf16.mxu1 %v2884_v5  ;;  %v3237_v33 = vsub.f32 %v1376_v58, %v1376_v58 }
  0xb4   :  { %2623 = vmatpush3.bf16.msra.mxu0 %v3031_v57 }
  0xb5   :  { %2696 = vmatprep.subr.bf16.mxu0 %v2884_v5  ;;  %2347 = vmatmul.mubr.f32.gmra.mrb[10].mxu1 %v819_v24  ;;  %v1460_v36 = vand.u32 4294901760, %v3237_v33 }
  0xb6   :  { %2644 = vmatpush3.bf16.msra.mxu1 %v3043_v2  ;;  %2365 = vmatprep.mubr.msk.f32.mxu1 %vm2885_vm0, %v2886_v27  ;;  %v1482_v2 = vsub.f32 %v3206_v50, %v1481_v29 }
  0xb7   :  { %2316 = vmatmul.mubr.msk.f32.vlgmr.msra.gmra.mrb[0].mxu0 %vm56_vm1, %v3065_v19  ;;  %2645 = vmatprep.subr.bf16.mxu1 %v2884_v5  ;;  %v1489_v19 = vsub.f32 %v3208_v21, %v1488_v32 }
  0xb8   :  { %2318 = vmatprep.mubr.msk.f32.mxu0 %vm2885_vm0, %v2886_v27  ;;  %2698 = vmatpush3.bf16.msra.mxu0 %v3225_v28  ;;  %v1483_v37 = vand.u32 4294901760, %v1482_v2 }
  0xb9   :  { %2699 = vmatprep.subr.bf16.mxu0 %v2884_v5  ;;  %v1490_v38 = vand.u32 4294901760, %v1489_v19 }
  0xba   :  { %2647 = vmatpush3.bf16.msra.mxu1 %v3049_v9  ;;  %v1452_v9 = vand.u32 4294901760, %v1451_v35 }
  0xbb   :  { %2319 = vmatmul.mubr.msk.f32.gmra.mrb[2].mxu0 %vm56_vm1, %v3073_v25  ;;  %2648 = vmatprep.subr.bf16.mxu1 %v2884_v5  ;;  %v1461_v25 = vsub.f32 %v3237_v33, %v1460_v36  ;;  %v2700_v39 = vpack.c.bf16 %v1490_v38, %v1483_v37 }
  0xbc   :  { %2321 = vmatprep.mubr.msk.f32.mxu0 %vm2885_vm0, %v2886_v27 }
  0xbd   :  { %2366 = vmatmul.mubr.msk.f32.vlgmr.msra.gmra.mrb[6].mxu1 %vm56_vm1, %v3107_v44 }
  0xbe   :  { %2650 = vmatpush3.bf16.msra.mxu1 %v2992_v30  ;;  %2368 = vmatprep.mubr.msk.f32.mxu1 %vm2885_vm0, %v2886_v27  ;;  %v1462_v30 = vand.u32 4294901760, %v1461_v25 }
  0xbf   :  { %2322 = vmatmul.mubr.msk.f32.gmra.mrb[4].mxu0 %vm56_vm1, %v3062_v18  ;;  %2651 = vmatprep.subr.bf16.mxu1 %v2884_v5  ;;  %v1361_v18 = vpop.permute.xlu0 %1360 }
  0xc0   :  { %2478 = vmatprep.mubr.msk.f32.mxu0 %vm2885_vm0, %v2886_v27  ;;  %vm1364_vm11 = vcmp.eq.s32.totalorder %v3057_v14, %v1361_v18 }
  0xc1   :  { %2369 = vmatmul.mubr.msk.f32.gmra.mrb[8].mxu1 %vm56_vm1, %v3121_v47 }
  0xc2   :  { %2653 = vmatpush3.bf16.msra.mxu1 %v3013_v40  ;;  %2371 = vmatprep.mubr.msk.f32.mxu1 %vm2885_vm0, %v2886_v27  ;;  %v2703_v40 = vpack.c.bf16 %v3208_v21, %v3206_v50 }
  0xc3   :  { %2479 = vmatmul.mubr.f32.vlgmr.msra.gmra.mrb[6].mxu0 %v1452_v9  ;;  %2654 = vmatprep.subr.bf16.mxu1 %v2884_v5 }
  0xc4   :  { %2481 = vmatprep.mubr.msk.f32.mxu0 %vm2885_vm0, %v2886_v27  ;;  %2701 = vmatpush3.bf16.msra.mxu0 %v2700_v39 }
  0xc5   :  { %2372 = vmatmul.mubr.msk.f32.gmra.mrb[10].mxu1 %vm56_vm1, %v3137_v51  ;;  %2702 = vmatprep.subr.bf16.mxu0 %v2884_v5 }
  0xc6   :  { %2656 = vmatpush3.bf16.msra.mxu1 %v3028_v54  ;;  %2390 = vmatprep.mubr.msk.f32.mxu1 %vm2885_vm0, %v2886_v27  ;;  %v3310_v54 = vsel %vm1364_vm11, 1.0, %v2886_v27 }
  0xc7   :  { %2482 = vmatmul.mubr.f32.gmra.mrb[8].mxu0 %v1462_v30  ;;  %2657 = vmatprep.subr.bf16.mxu1 %v2884_v5 }
  0xc8   :  { %2491 = vmatprep.mubr.msk.f32.mxu0 %vm2885_vm0, %v2886_v27 }
  0xca   :  { %2659 = vmatpush3.bf16.msra.mxu1 %v3037_v61  ;;  %v1379_v61 = vsel %vm1371_vm9, %v3310_v54, 0 }
  0xcb   :  { %2492 = vmatmul.mubr.msk.f32.vlgmr.msra.gmra.mrb[6].mxu0 %vm1371_vm9, %v3192_v15  ;;  %2660 = vmatprep.subr.bf16.mxu1 %v2884_v5  ;;  %v1469_v14 = vsub.f32 %v1379_v61, %v1379_v61 }
  0xcc   :  { %2494 = vmatprep.mubr.msk.f32.mxu0 %vm2885_vm0, %v2886_v27  ;;  %2704 = vmatpush3.bf16.msra.mxu0 %v2703_v40 }
  0xcd   :  { %2391 = vmatmul.mubr.f32.vlgmr.msra.gmra.mrb[6].mxu1 %v3127_v48  ;;  %2705 = vmatprep.subr.bf16.mxu0 %v2884_v5 }
  0xce   :  { %2662 = vmatpush3.bf16.msra.mxu1 %v2964_v16  ;;  %2393 = vmatprep.mubr.msk.f32.mxu1 %vm2885_vm0, %v2886_v27 }
  0xcf   :  { %2495 = vmatmul.mubr.msk.f32.gmra.mrb[8].mxu0 %vm1371_vm9, %v3215_v23  ;;  %2663 = vmatprep.subr.bf16.mxu1 %v2884_v5 }
  0xd0   :  { %2497 = vmatprep.mubr.msk.f32.mxu0 %vm2885_vm0, %v2886_v27 }
  0xd1   :  { %2394 = vmatmul.mubr.f32.gmra.mrb[8].mxu1 %v3147_v53 }
  0xd2   :  { %2665 = vmatpush3.bf16.msra.mxu1 %v2994_v31  ;;  %2396 = vmatprep.mubr.msk.f32.mxu1 %vm2885_vm0, %v2886_v27 }
  0xd3   :  { %2498 = vmatmul.mubr.msk.f32.gmra.mrb[10].mxu0 %vm1371_vm9, %v3310_v54  ;;  %2666 = vmatprep.subr.bf16.mxu1 %v2884_v5 }
  0xd4   :  { %2504 = vmatprep.mubr.msk.f32.mxu0 %vm2885_vm0, %v2886_v27 }
  0xd5   :  { %2397 = vmatmul.mubr.f32.gmra.mrb[10].mxu1 %v3162_v59 }
  0xd6   :  { %2668 = vmatpush3.bf16.msra.mxu1 %v3015_v41  ;;  %2415 = vmatprep.mubr.msk.f32.mxu1 %vm2885_vm0, %v2886_v27 }
  0xd7   :  { %2505 = vmatmul.mubr.f32.vlgmr.msra.gmra.mrb[6].mxu0 %v3222_v26  ;;  %2669 = vmatprep.subr.bf16.mxu1 %v2884_v5 }
  0xd8   :  { %2507 = vmatprep.mubr.msk.f32.mxu0 %vm2885_vm0, %v2886_v27  ;;  %2707 = vmatpush3.bf16.msra.mxu0 %v3225_v28 }
  0xd9   :  { %2708 = vmatprep.subr.bf16.mxu0 %v2884_v5 }
  0xda   :  { %2671 = vmatpush3.bf16.msra.mxu1 %v3031_v57 }
  0xdb   :  { %2508 = vmatmul.mubr.f32.gmra.mrb[8].mxu0 %v3237_v33  ;;  %2672 = vmatprep.subr.bf16.mxu1 %v2884_v5 }
  0xdc   :  { %2510 = vmatprep.mubr.msk.f32.mxu0 %vm2885_vm0, %v2886_v27 }
  0xdd   :  { %2416 = vmatmul.mubr.f32.vlgmr.msra.gmra.mrb[6].mxu1 %v797_v52 }
  0xde   :  { %2674 = vmatpush3.bf16.msra.mxu1 %v3046_v6  ;;  %2418 = vmatprep.mubr.msk.f32.mxu1 %vm2885_vm0, %v2886_v27  ;;  %v1470_v6 = vand.u32 4294901760, %v1469_v14 }
  0xdf   :  { %2511 = vmatmul.mubr.f32.gmra.mrb[10].mxu0 %v1469_v14  ;;  %2675 = vmatprep.subr.bf16.mxu1 %v2884_v5 }
  0xe0   :  { %2517 = vmatprep.mubr.msk.f32.mxu0 %vm2885_vm0, %v2886_v27 }
  0xe1   :  { %2419 = vmatmul.mubr.f32.gmra.mrb[8].mxu1 %v807_v60 }
  0xe2   :  { %2677 = vmatpush3.bf16.msra.mxu1 %v3051_v10  ;;  %2421 = vmatprep.mubr.msk.f32.mxu1 %vm2885_vm0, %v2886_v27 }
  0xe3   :  { %2518 = vmatmul.mubr.f32.vlgmr.msra.gmra.mrb[6].mxu0 %v1450_v34  ;;  %2678 = vmatprep.subr.bf16.mxu1 %v2884_v5 }
  0xe4   :  { %2520 = vmatprep.mubr.msk.f32.mxu0 %vm2885_vm0, %v2886_v27  ;;  %2710 = vmatpush3.bf16.msra.mxu0 %v2709_v42 }
  0xe5   :  { %2422 = vmatmul.mubr.f32.gmra.mrb[10].mxu1 %v817_v4  ;;  %2711 = vmatprep.subr.bf16.mxu0 %v2884_v5 }
  0xe6   :  { %2680 = vmatpush3.bf16.msra.mxu1 %v3053_v11  ;;  %2440 = vmatprep.mubr.msk.f32.mxu1 %vm2885_vm0, %v2886_v27 }
  0xe7   :  { %2521 = vmatmul.mubr.f32.gmra.mrb[8].mxu0 %v1460_v36  ;;  %2681 = vmatprep.subr.bf16.mxu1 %v2884_v5 }
  0xe8   :  { %2523 = vmatprep.mubr.msk.f32.mxu0 %vm2885_vm0, %v2886_v27 }
  0xea   :  { %2683 = vmatpush3.bf16.msra.mxu1 %v3055_v12 }
  0xeb   :  { %2524 = vmatmul.mubr.f32.gmra.mrb[10].mxu0 %v1470_v6  ;;  %2684 = vmatprep.subr.bf16.mxu1 %v2884_v5 }
  0xec   :  { %2530 = vmatprep.mubr.msk.f32.mxu0 %vm2885_vm0, %v2886_v27 }
  0xed   :  { %2441 = vmatmul.mubr.msk.f32.vlgmr.msra.gmra.mrb[6].mxu1 %vm56_vm1, %v3107_v44 }
  0xee   :  { %2686 = vmatpush3.bf16.msra.mxu1 %v2964_v16  ;;  %2443 = vmatprep.mubr.msk.f32.mxu1 %vm2885_vm0, %v2886_v27 }
  0xef   :  { %2531 = vmatmul.mubr.msk.f32.vlgmr.msra.gmra.mrb[6].mxu0 %vm1371_vm9, %v3192_v15  ;;  %2687 = vmatprep.subr.bf16.mxu1 %v2884_v5 }
  0xf0   :  { %2533 = vmatprep.mubr.msk.f32.mxu0 %vm2885_vm0, %v2886_v27  ;;  %2713 = vmatpush3.bf16.msra.mxu0 %v3225_v28 }
  0xf1   :  { %2444 = vmatmul.mubr.msk.f32.gmra.mrb[8].mxu1 %vm56_vm1, %v3121_v47 }
  0xf2   :  { %2689 = vmatpush3.bf16.msra.mxu1 %v2994_v31  ;;  %2446 = vmatprep.mubr.msk.f32.mxu1 %vm2885_vm0, %v2886_v27 }
  0xf3   :  { %2534 = vmatmul.mubr.msk.f32.gmra.mrb[8].mxu0 %vm1371_vm9, %v3215_v23  ;;  %2690 = vmatprep.subr.bf16.mxu1 %v2884_v5 }
  0xf4   :  { %2536 = vmatprep.mubr.msk.f32.mxu0 %vm2885_vm0, %v2886_v27 }
  0xf5   :  { %2447 = vmatmul.mubr.msk.f32.gmra.mrb[10].mxu1 %vm56_vm1, %v3137_v51 }
  0xf6   :  { %2692 = vmatpush3.bf16.msra.mxu1 %v3015_v41  ;;  %2465 = vmatprep.mubr.msk.f32.mxu1 %vm2885_vm0, %v2886_v27 }
  0xf7   :  { %2537 = vmatmul.mubr.msk.f32.gmra.mrb[10].mxu0 %vm1371_vm9, %v3310_v54  ;;  %2693 = vmatprep.subr.bf16.mxu1 %v2884_v5 }
  0xf8   :  { %2543 = vmatprep.mubr.msk.f32.mxu0 %vm2885_vm0, %v2886_v27 }
  0xfa   :  { %2695 = vmatpush3.bf16.msra.mxu1 %v3031_v57 }
  0xfb   :  { %2544 = vmatmul.mubr.msk.f32.vlgmr.msra.gmra.mrb[6].mxu0 %vm1371_vm9, %v3192_v15  ;;  %2714 = vmatprep.subr.bf16.mxu1 %v2884_v5  ;;  %v1471_v5 = vsub.f32 %v1469_v14, %v1470_v6 }
  0xfc   :  { %2546 = vmatprep.mubr.msk.f32.mxu0 %vm2885_vm0, %v2886_v27 }
  0xfd   :  { %2466 = vmatmul.mubr.msk.f32.vlgmr.msra.gmra.mrb[6].mxu1 %vm56_vm1, %v3107_v44  ;;  %v1472_v16 = vand.u32 4294901760, %v1471_v5 }
  0xfe   :  { %2715 = vmatpush3.bf16.msra.mxu1 %v3225_v28  ;;  %2468 = vmatprep.mubr.msk.f32.mxu1 %vm2885_vm0, %v2886_v27 }
  0xff   :  { %2547 = vmatmul.mubr.msk.f32.gmra.mrb[8].mxu0 %vm1371_vm9, %v3215_v23 }
 0x100   :  { %2549 = vmatprep.mubr.msk.f32.mxu0 %vm2885_vm0, %v2886_v27 }
 0x101   :  { %2469 = vmatmul.mubr.msk.f32.gmra.mrb[8].mxu1 %vm56_vm1, %v3121_v47 }
 0x102   :  { %2471 = vmatprep.mubr.msk.f32.mxu1 %vm2885_vm0, %v2886_v27 }
 0x103   :  { %2550 = vmatmul.mubr.msk.f32.gmra.mrb[10].mxu0 %vm1371_vm9, %v3310_v54 }
 0x105   :  { %2472 = vmatmul.mubr.msk.f32.gmra.mrb[10].mxu1 %vm56_vm1, %v3137_v51 }
 0x106   :  { %2484 = vmatprep.mubr.msk.f32.mxu1 %vm2885_vm0, %v2886_v27 }
 0x109   :  { %2485 = vmatmul.mubr.f32.vlgmr.msra.gmra.mrb[12].mxu1 %v1472_v16 }
 0x170   :  { %v276_v31 = vpop.f32.mrb[0].mxu1 }
 0x171   :  { %v2217_v41 = vpop.f32.mrb[1].mxu1 }
 0x174   :  { %v282_v57 = vpop.f32.mrb[2].mxu1 }
 0x175   :  { %v2220_v10 = vpop.f32.mrb[3].mxu1 }
 0x178   :  { %v288_v11 = vpop.f32.mrb[4].mxu1 }
 0x179   :  { %v2223_v12 = vpop.f32.mrb[5].mxu1 }
 0x18a   :  { %v673_v43 = vpop.f32.mrb[0].mxu0 }
 0x18b   :  { %v2716_v44 = vadd.f32 %v673_v43, %v276_v31  ;;  %v2317_v45 = vpop.f32.mrb[1].mxu0 }
 0x18d   :  { %689 = vst [vmem:[#allocation2] sm:$0xff] %v2716_v44 }
 0x18e   :  { %v679_v46 = vpop.f32.mrb[2].mxu0 }
 0x18f   :  { %v2717_v47 = vadd.f32 %v679_v46, %v282_v57  ;;  %v2320_v48 = vpop.f32.mrb[3].mxu0 }
 0x191   :  { %690 = vst [vmem:[#allocation2 + $0x8] sm:$0xff] %v2717_v47 }
 0x192   :  { %v685_v49 = vpop.f32.mrb[4].mxu0 }
 0x193   :  { %v2718_v27 = vadd.f32 %v685_v49, %v288_v11  ;;  %v2323_v51 = vpop.f32.mrb[5].mxu0 }
 0x195   :  { %691 = vst [vmem:[#allocation2 + $0x10] sm:$0xff] %v2718_v27 }
 0x196   :  { %2824 = shalt.err (!%p2821_p4)
}
 0x197   :  { %s2825_s15 = scalar_lea.hbm %s3488_s5, 384 }
 0x198   :  { %p2826_p5 = scmp.ne.s32.totalorder %s3488_s5, %s2825_s15  ;;  %p2829_p6 = scmp.lt.u32.totalorder %s2825_s15, %s3488_s5 }
 0x19a   :  { %p2831_p7 = pnand %p2829_p6, %p2826_p5 }
 0x19c   :  { %2834 = shalt.err (!%p2831_p7)
}
 0x19d   :  { %s2888_s20 = smov 128   ;;  %s2889_s21 = smov 8  }
 0x19e   :  { %1940 = dma.vmem_to_hbm [thread:$0]  %s1935_s12, 384, %s3488_s5, [#allocation3], %s2888_s20, %s2888_s20, %s2889_s21  }
 0x19f   :  { %s2890_s24 = smov [#allocation4]   ;;  %s2891_s5 = smov [#allocation6]  }
 0x1a0   :  { %s1946_s25 = sshll.u32 %s2890_s24, 4  ;;  %s1958_s26 = sshll.u32 %s2891_s5, 4  ;;  %s1947_s25 = int_to_ptr.vmem [resolvable:$true] %s1946_s25  ;;  %s3446_s26 = int_to_ptr.vmem [resolvable:$true] %s1958_s26 }
 0x1a1   :  { %s2835_s27 = scalar_lea.vmem %s1947_s25, 384  ;;  %p2840_p9 = scmp.lt.s32.totalorder %s1947_s25, %s1947_s25 }
 0x1a2   :  { %p2836_p8 = scmp.ne.s32.totalorder %s1947_s25, %s2835_s27  ;;  %p2841_p10 = scmp.lt.s32.totalorder %s2835_s27, %s2835_s27 }
 0x1a4   :  { %p2842_p11 = por %p2841_p10, %p2840_p9 }
 0x1a6   :  { %p2843_p12 = pnand %p2842_p11, %p2836_p8 }
 0x1ce   :  { %v1910_v52 = vpop.f32.mrb[6].mxu0 }
 0x1cf   :  { %1926 = vst [vmem:[#allocation4] sm:$0xff] %v1910_v52  ;;  %v2545_v53 = vpop.f32.mrb[7].mxu0 }
 0x1d0   :  { %v1329_v55 = vpop.f32.mrb[6].mxu1 }
 0x1d1   :  { %1345 = vst [vmem:[#allocation6] sm:$0xff] %v1329_v55  ;;  %v2467_v56 = vpop.f32.mrb[7].mxu1 }
 0x1d2   :  { %v1916_v59 = vpop.f32.mrb[8].mxu0 }
 0x1d3   :  { %1927 = vst [vmem:[#allocation4 + $0x8] sm:$0xff] %v1916_v59  ;;  %v2548_v60 = vpop.f32.mrb[9].mxu0 }
 0x1d4   :  { %v1335_v62 = vpop.f32.mrb[8].mxu1 }
 0x1d5   :  { %1346 = vst [vmem:[#allocation6 + $0x8] sm:$0xff] %v1335_v62  ;;  %v2470_v63 = vpop.f32.mrb[9].mxu1 }
 0x1d6   :  { %v1922_v0 = vpop.f32.mrb[10].mxu0 }
 0x1d7   :  { %v2551_v1 = vpop.f32.mrb[11].mxu0 }
 0x1d8   :  { %v1341_v3 = vpop.f32.mrb[10].mxu1 }
 0x1d9   :  { %1347 = vst [vmem:[#allocation6 + $0x10] sm:$0xff] %v1341_v3  ;;  %v2473_v4 = vpop.f32.mrb[11].mxu1 }
 0x1dc   :  { %v1474_v7 = vpop.f32.mrb[12].mxu1 }
 0x1dd   :  { %v2719_v8 = vadd.f32 %v1922_v0, %v1474_v7  ;;  %v2486_v13 = vpop.f32.mrb[13].mxu1 }
 0x1df   :  { %1928 = vst [vmem:[#allocation4 + $0x10] sm:$0xff] %v2719_v8 }
 0x1e0   :  { %2846 = shalt.err (!%p2843_p12)
}
 0x1e1   :  { %s2847_s28 = scalar_lea.hbm %s3489_s6, 384 }
 0x1e2   :  { %p2848_p13 = scmp.ne.s32.totalorder %s3489_s6, %s2847_s28  ;;  %p2851_p0 = scmp.lt.u32.totalorder %s2847_s28, %s3489_s6 }
 0x1e4   :  { %p2853_p1 = pnand %p2851_p0, %p2848_p13 }
 0x1e6   :  { %2856 = shalt.err (!%p2853_p1)
}
 0x1e7   :  { %1952 = dma.vmem_to_hbm [thread:$0]  %s1947_s25, 384, %s3489_s6, [#allocation5], %s2888_s20, %s2888_s20, %s2889_s21  }
 0x1e8   :  { %s2857_s11 = scalar_lea.vmem %s3446_s26, 384  ;;  %p2862_p3 = scmp.lt.s32.totalorder %s3446_s26, %s3446_s26 }
 0x1e9   :  { %p2858_p2 = scmp.ne.s32.totalorder %s3446_s26, %s2857_s11  ;;  %p2863_p4 = scmp.lt.s32.totalorder %s2857_s11, %s2857_s11 }
 0x1eb   :  { %p2864_p5 = por %p2863_p4, %p2862_p3 }
 0x1ed   :  { %p2865_p6 = pnand %p2864_p5, %p2858_p2 }
 0x1ef   :  { %2868 = shalt.err (!%p2865_p6)
}
 0x1f0   :  { %s2869_s13 = scalar_lea.hbm %s3490_s7, 384 }
 0x1f1   :  { %p2870_p7 = scmp.ne.s32.totalorder %s3490_s7, %s2869_s13  ;;  %p2873_p8 = scmp.lt.u32.totalorder %s2869_s13, %s3490_s7 }
 0x1f3   :  { %p2875_p9 = pnand %p2873_p8, %p2870_p7 }
 0x1f5   :  { %2878 = shalt.err (!%p2875_p9)
}
 0x1f6   :  { %1964 = dma.vmem_to_hbm [thread:$0]  %s3446_s26, 384, %s3490_s7, [#allocation5], %s2888_s20, %s2888_s20, %s2889_s21  }
 0x1f7   :  { %2879 = dma.done.wait [#allocation3], 384  }
 0x1f8   :  { %2880 = vsyncadd [#allocation3], 4294966912 }
 0x1f9   :  { %2881 = dma.done.wait [#allocation5], 768  }
 0x1fa   :  { %2882 = vsyncadd [#allocation5], 4294966528 }
 0x1fb   :  { %1974 = vsyncpa [#allocation3], 1 }
 0x1fc   :  { %1975 = vsyncpa [#allocation5], 1 }

</bundles_post_ra>
